<compile_context>
chip_gen: v7x
topology: tpu7x:2x2x1
jax: 0.10.0
libtpu: 0.0.40
codegen_flags: <defaults>
</compile_context>

<pallas_src>
from abc import ABC, abstractmethod
import math

import jax
import jax.numpy as jnp
from jax.experimental import pallas as pl
from jax.experimental.pallas import tpu as pltpu


_LANE = 128
_SUB = 8
_MAX_LANE_CHUNKS = 64      # bounds in-kernel unrolling along the minor axis (wide path)
_MAX_GROUPS = 64           # bounds in-kernel unrolling over sublane groups (narrow path)
_C_FULL_MAX = 16384        # above this, tile the feature axis (out-block size guard)
_C_TILE_MAX = 8192


def _round_up(x, m):
    return ((x + m - 1) // m) * m


def _largest_divisor(n, cap, step=1, search=4096):
    """Largest d <= cap with d % step == 0 and n % d == 0 (bounded search)."""
    cap = int(max(step, min(cap, n)))
    d = (cap // step) * step
    tries = 0
    while d >= step and tries < search:
        if n % d == 0:
            return d
        d -= step
        tries += 1
    return step if (n % step == 0) else 1


def _vmem_budget():
    """(per-input-buffer byte budget, vmem_limit cap) per TPU generation."""
    vmem_bytes = None
    try:
        info = pltpu.get_tpu_info()
        for name in ("vmem_capacity_bytes", "vmem_size_bytes", "vmem_bytes"):
            v = getattr(info, name, None)
            if v:
                vmem_bytes = int(v)
                break
    except Exception:
        vmem_bytes = None
    if vmem_bytes is None or vmem_bytes <= (64 << 20):
        # v7x-like (64 MiB physical / 32 MiB scoped default) or unknown: conservative.
        return (4 << 20), (32 << 20)
    # v5e / v6e (128 MiB physical): bigger tiles are free bandwidth.
    return (8 << 20), (96 << 20)


# ----------------------------------------------------------------------------
# Wide path: post >= 128.  Blocks (P_TILE, C_TILE, TILE_M).
# ----------------------------------------------------------------------------
def _make_kernel_wide(m_chunks, n_k):
    def kernel(x_ref, out_ref):
        # x_ref: (P, Ct, TILE_M) block in VMEM.
        # out_ref: (1, 1, Ct, 128) f32, resident across the k (reduction) axis.
        def chunk(j):
            sl = x_ref[:, :, j * _LANE:(j + 1) * _LANE]              # (P, Ct, 128)
            # abs in the native dtype (bf16 abs on v6e/v7x), f32 accumulation.
            return jnp.sum(jnp.abs(sl).astype(jnp.float32), axis=0)  # VPU adds only

        local = chunk(0)
        for j in range(1, m_chunks):
            local = local + chunk(j)

        if n_k == 1:
            out_ref[0, 0] = local
        else:
            k = pl.program_id(2)

            @pl.when(k == 0)
            def _init():
                out_ref[...] = jnp.zeros_like(out_ref)

            # Single accumulator read-modify-write per grid step.
            out_ref[0, 0] += local

    return kernel


def _feature_sums_wide(x3, per_buf, limit_cap):
    """x3: (pre, C, post), post >= 128.  Returns per-feature |x| sums, (C,) f32."""
    pre, c, post = x3.shape
    itemsize = jnp.dtype(x3.dtype).itemsize

    # ---- feature-axis tiling (guards the (Ct,128) output block for huge C) ----
    if c <= _C_FULL_MAX or c % _SUB != 0:
        c_tile, n_c = c, 1
        # TODO(synk): for huge C that is not a multiple of 8, zero-pad the feature
        # axis instead of keeping a single (possibly large) C block.
    else:
        c_tile = _largest_divisor(c, _C_TILE_MAX, step=_SUB)
        n_c = c // c_tile
    c_eff = _round_up(c_tile, _SUB)            # sublane-padded VMEM footprint

    # ---- minor-axis tiling: prefer the full (contiguous) post extent ----
    m = _round_up(post, _LANE)
    cap_m = max(_LANE, (per_buf // max(1, c_eff * itemsize)) // _LANE * _LANE)
    cap_m = min(cap_m, _MAX_LANE_CHUNKS * _LANE)
    if m <= cap_m:
        tile_m, n_k = m, 1
    else:
        n_k = pl.cdiv(m, cap_m)
        tile_m = _round_up(pl.cdiv(m, n_k), _LANE)
    m_pad = n_k * tile_m
    if m_pad != post:
        # |0| contributes nothing to the abs-sum.
        x3 = jnp.pad(x3, ((0, 0), (0, 0), (0, m_pad - post)))

    # ---- fold pre rows into the block to keep DMAs large ----
    block_eff = c_eff * tile_m * itemsize
    p_tile = _largest_divisor(pre, max(1, per_buf // max(1, block_eff)))
    n_b = pre // p_tile
    # TODO(synk): zero-pad `pre` when it has no usable divisor (prime pre, tiny C*post).

    m_chunks = tile_m // _LANE
    kernel = _make_kernel_wide(m_chunks, n_k)

    in_block = p_tile * c_eff * tile_m * itemsize
    out_block = c_eff * _LANE * 4
    chunk_tmp = p_tile * c_eff * _LANE * 4            # one f32 chunk slab
    need = 2 * in_block + 2 * out_block + chunk_tmp + (1 << 20)
    vmem_limit = int(min(max(need + (2 << 20), 16 << 20), limit_cap))
    if vmem_limit < need + (1 << 20):
        vmem_limit = int(need + (2 << 20))

    total = pre * c * m_pad
    cost = pl.CostEstimate(
        flops=2 * total,
        transcendentals=0,
        bytes_accessed=total * itemsize + n_b * n_c * c_tile * _LANE * 4,
    )

    out = pl.pallas_call(
        kernel,
        out_shape=jax.ShapeDtypeStruct((n_b, n_c, c_tile, _LANE), jnp.float32),
        grid_spec=pltpu.PrefetchScalarGridSpec(
            num_scalar_prefetch=0,
            grid=(n_b, n_c, n_k),
            in_specs=[pl.BlockSpec((p_tile, c_tile, tile_m),
                                   lambda b, cb, k: (b, cb, k))],
            out_specs=pl.BlockSpec((1, 1, c_tile, _LANE),
                                   lambda b, cb, k: (b, cb, 0, 0)),
        ),
        compiler_params=pltpu.CompilerParams(
            dimension_semantics=("parallel", "parallel", "arbitrary"),
            vmem_limit_bytes=vmem_limit,
        ),
        cost_estimate=cost,
    )(x3)
    # Tiny cross-block combine in XLA (this is also where the v7x 2-TC split joins).
    return out.sum(axis=(0, 3)).reshape(c)


# ----------------------------------------------------------------------------
# Narrow path: post < 128 (incl. dim == last axis).  Lane-dense (pre, C*post).
# ----------------------------------------------------------------------------
def _make_kernel_narrow(n_groups):
    def kernel(x_ref, out_ref):
        # x_ref: (TILE_PRE, TILE_W) block; out_ref: (1, 1, TILE_W) f32.
        acc = jnp.abs(x_ref[0:_SUB, :]).astype(jnp.float32)
        for g in range(1, n_groups):
            acc = acc + jnp.abs(x_ref[g * _SUB:(g + 1) * _SUB, :]).astype(jnp.float32)
        # One sublane reduce per block, lane-dense unmasked store.
        out_ref[0] = jnp.sum(acc, axis=0, keepdims=True)

    return kernel


def _feature_sums_narrow(x3, per_buf, limit_cap):
    """x3: (pre, C, post), post < 128.  Returns per-feature |x| sums, (C,) f32."""
    pre, c, post = x3.shape
    itemsize = jnp.dtype(x3.dtype).itemsize
    width = c * post
    x2 = x3.reshape(pre, width)            # row-major relinearization, no transpose

    width_pad = _round_up(width, _LANE)
    # Tile the lane axis only if a minimal (8 x width) block would overflow the budget.
    if width_pad * _SUB * itemsize <= per_buf:
        tile_w, n_w = width_pad, 1
    else:
        tile_w = max(_LANE, (per_buf // (_SUB * itemsize)) // _LANE * _LANE)
        n_w = pl.cdiv(width_pad, tile_w)
        width_pad = n_w * tile_w

    row_bytes = tile_w * itemsize
    ptile_cap = max(_SUB, min(_MAX_GROUPS * _SUB,
                              (per_buf // max(1, row_bytes)) // _SUB * _SUB))
    n_b = pl.cdiv(pre, ptile_cap)
    tile_pre = _round_up(pl.cdiv(pre, n_b), _SUB)
    pre_pad = n_b * tile_pre

    if pre_pad != pre or width_pad != width:
        x2 = jnp.pad(x2, ((0, pre_pad - pre), (0, width_pad - width)))

    kernel = _make_kernel_narrow(tile_pre // _SUB)

    in_block = tile_pre * tile_w * itemsize
    out_block = tile_w * 4
    need = 2 * in_block + 2 * out_block + 2 * _SUB * tile_w * 4 + (1 << 20)
    vmem_limit = int(min(max(need + (2 << 20), 16 << 20), limit_cap))
    if vmem_limit < need + (1 << 20):
        vmem_limit = int(need + (2 << 20))

    total = pre_pad * width_pad
    cost = pl.CostEstimate(
        flops=2 * total,
        transcendentals=0,
        bytes_accessed=total * itemsize + n_b * width_pad * 4,
    )

    out = pl.pallas_call(
        kernel,
        out_shape=jax.ShapeDtypeStruct((n_b, 1, width_pad), jnp.float32),
        grid_spec=pltpu.PrefetchScalarGridSpec(
            num_scalar_prefetch=0,
            grid=(n_b, n_w),
            in_specs=[pl.BlockSpec((tile_pre, tile_w), lambda b, w: (b, w))],
            out_specs=pl.BlockSpec((1, 1, tile_w), lambda b, w: (b, 0, w)),
        ),
        compiler_params=pltpu.CompilerParams(
            dimension_semantics=("parallel", "parallel"),
            vmem_limit_bytes=vmem_limit,
        ),
        cost_estimate=cost,
    )(x2)
    col = out.reshape(n_b, width_pad).sum(axis=0)[:width]   # per-column |x| sums
    return col.reshape(c, post).sum(axis=1)                  # fold post -> (C,)


def _num_features_pallas(x3):
    """x3: (pre, C, post) -> int32 count of features with non-zero |x| sum."""
    pre, c, post = x3.shape
    if pre == 0 or c == 0 or post == 0:
        return jnp.int32(0)
    per_buf, limit_cap = _vmem_budget()
    if post < _LANE:
        feat = _feature_sums_narrow(x3, per_buf, limit_cap)
    else:
        feat = _feature_sums_wide(x3, per_buf, limit_cap)
    return jnp.sum((feat != 0.0).astype(jnp.int32))


# ----------------------------------------------------------------------------
# BaseAllocator mirror (JAX).
# ----------------------------------------------------------------------------
class BaseAllocator(ABC):
    """Base Allocator implementation containing basic functionality (JAX)."""

    def __init__(self, **kwargs):
        # registered buffer `_allocation` (starts empty, like torch.Tensor())
        self._allocation = jnp.zeros((0,), dtype=jnp.int32)
        self._offsets = {}
        self._last_ratio = None

    # --- glue (slicing / reshape) --------------------------------------------
    def _extract(self, arr, offsets, ell):
        """Extract layer quantities from flat array."""
        arr_layer = arr[offsets[ell][0]:offsets[ell][1]]
        arr_layer = arr_layer.reshape(2, -1)
        return arr_layer

    def _allocate_budget(self, keep_ratio, size_original):
        """Allocate the budget with this internal function."""
        if self._last_ratio == keep_ratio:
            return
        self._last_ratio = keep_ratio
        self._allocate_method(keep_ratio, size_original)

    @abstractmethod
    def _allocate_method(self, keep_ratio, size_original):
        """Allocate the samples."""
        raise NotImplementedError

    def get_num_samples(self, layer):
        """Get the number of samples for a particular layer index."""
        return self._extract(self._allocation, self._offsets, layer)

    # --- hot path: Pallas reduction -------------------------------------------
    def get_num_features(self, tensor, dim):
        """Number of non-zero features in `dim` (Pallas TPU kernel)."""
        tensor = jnp.asarray(tensor)
        nd = tensor.ndim
        if nd == 0:
            return (jnp.abs(tensor) != 0).astype(jnp.int32)
        dim = dim % nd
        # Row-major relinearization only -- NO transpose; the kernel reduces
        # over axes 0 and 2 of (pre, C, post).
        pre = math.prod(tensor.shape[:dim])
        c = tensor.shape[dim]
        post = math.prod(tensor.shape[dim + 1:])
        if pre == 0 or c == 0 or post == 0:
            return jnp.int32(0)
        return _num_features_pallas(tensor.reshape(pre, c, post))

    def forward(self, x):
        """Fake forward function (no-op, like the PyTorch base class)."""
        return None

    def __call__(self, x):
        return self.forward(x)


class UniformAllocator(BaseAllocator):
    """Simple concrete allocator: uniform per-layer budget (deterministic)."""

    def __init__(self, layer_sizes, **kwargs):
        super().__init__(**kwargs)
        self._layer_sizes = list(layer_sizes)

    def _allocate_method(self, keep_ratio, size_original):
        allocs = []
        offsets = {}
        cursor = 0
        for ell, sz in enumerate(self._layer_sizes):
            n = int(max(1, round(keep_ratio * sz)))
            layer_alloc = jnp.array([n, n], dtype=jnp.int32)  # view(2, -1) later
            allocs.append(layer_alloc)
            offsets[ell] = (cursor, cursor + layer_alloc.shape[0])
            cursor += layer_alloc.shape[0]
        self._allocation = jnp.concatenate(allocs)
        self._offsets = offsets


# ----------------------------------------------------------------------------
# Demo / self-test.
# ----------------------------------------------------------------------------
if __name__ == "__main__":
    key = jax.random.PRNGKey(0)
    k1, k2, k3, k4, k5, k6, k7 = jax.random.split(key, 7)

    alloc = UniformAllocator(layer_sizes=[64, 128, 256])

    def ref_count(x, dim):
        d = dim % x.ndim
        axes = tuple(i for i in range(x.ndim) if i != d)
        s = jnp.sum(jnp.abs(x.astype(jnp.float32)), axis=axes)
        return int(jnp.sum((s != 0).astype(jnp.int32)))

    # 1) NCHW activations, dim=1 (channels) -> wide path, single contiguous block.
    x = jax.random.normal(k1, (2, 4, 16, 16), dtype=jnp.float32)
    x = x.at[:, 2, :, :].set(0.0)
    _ = alloc(x)  # fake forward: no-op (matches the PyTorch base class)
    n = jax.block_until_ready(alloc.get_num_features(x, dim=1))
    assert int(n) == ref_count(x, 1) == 3, (int(n), ref_count(x, 1))

    # 2) larger spatial extent -> pre rows folded into one big block (wide path).
    y = jax.random.normal(k2, (2, 4, 32, 80), dtype=jnp.float32)
    y = y.at[:, 0].set(0.0).at[:, 3].set(0.0)
    n = alloc.get_num_features(y, dim=1)
    assert int(n) == ref_count(y, 1) == 2, int(n)

    # 3) 2-D weight, dim=0 -> wide path.
    w = jax.random.normal(k3, (32, 256), dtype=jnp.float32)
    w = w.at[5, :].set(0.0).at[17, :].set(0.0)
    n = alloc.get_num_features(w, dim=0)
    assert int(n) == ref_count(w, 0) == 30, int(n)

    # 4) 2-D weight, dim=-1 (last axis) -> lane-dense narrow path.
    v = jax.random.normal(k4, (32, 256), dtype=jnp.float32)
    v = v.at[:, 3].set(0.0).at[:, 100].set(0.0)
    n = alloc.get_num_features(v, dim=-1)
    assert int(n) == ref_count(v, -1) == 254, int(n)

    # 5) small ragged tensor (post < 128) -> narrow path with zero-padding.
    z = jax.random.normal(k5, (3, 5, 7), dtype=jnp.float32)
    z = z.at[:, 2, :].set(0.0).at[:, 4, :].set(0.0)
    n = alloc.get_num_features(z, dim=1)
    assert int(n) == ref_count(z, 1) == 3, int(n)

    # 6) bf16 activations (abs in bf16, f32 accumulation).
    b = jax.random.normal(k6, (2, 8, 16, 24), dtype=jnp.float32).astype(jnp.bfloat16)
    b = b.at[:, 1].set(0).at[:, 6].set(0)
    n = alloc.get_num_features(b, dim=1)
    assert int(n) == ref_count(b, 1) == 6, int(n)

    # 7) ragged post >= 128 -> zero-padded minor axis (wide path).
    r = jax.random.normal(k7, (2, 4, 130), dtype=jnp.float32)
    r = r.at[:, 0, :].set(0.0)
    n = alloc.get_num_features(r, dim=1)
    assert int(n) == ref_count(r, 1) == 3, int(n)

    # allocation bookkeeping (host-side glue): budget + per-layer extraction
    alloc._allocate_budget(keep_ratio=0.5, size_original=sum(alloc._layer_sizes))
    samples_l1 = jax.block_until_ready(alloc.get_num_samples(1))
    assert samples_l1.shape == (2, 1)

    print("KERNEL_OK")
</pallas_src>

<mosaic_0001>
module attributes {stable_mosaic.version = 11 : i64} {
  func.func @kernel(%arg0: i32, %arg1: i32, %arg2: i32, %arg3: memref<2x4x256xf32, #tpu.memory_space<vmem>>, %arg4: memref<1x1x4x128xf32, #tpu.memory_space<vmem>>) attributes {dimension_semantics = [#tpu.dimension_semantics<parallel>, #tpu.dimension_semantics<parallel>, #tpu.dimension_semantics<arbitrary>], iteration_bounds = array<i64: 1, 1, 1>, scalar_prefetch = 0 : i64, scratch_operands = 0 : i64, tpu.core_type = #tpu.core_type<tc>, window_params = [{transform_indices = @transform_0, window_bounds = array<i64: 2, 4, 256>}, {transform_indices = @transform_1, window_bounds = array<i64: 1, 1, 4, 128>}]} {
    %c0 = arith.constant 0 : index
    %c0_0 = arith.constant 0 : index
    %c0_1 = arith.constant 0 : index
    %0 = vector.load %arg3[%c0, %c0_0, %c0_1] : memref<2x4x256xf32, #tpu.memory_space<vmem>>, vector<2x4x128xf32>
    %1 = math.absf %0 : vector<2x4x128xf32>
    %cst = arith.constant dense<0.000000e+00> : vector<4x128xf32>
    %2 = vector.multi_reduction <add>, %1, %cst [0] : vector<2x4x128xf32> to vector<4x128xf32>
    %c0_2 = arith.constant 0 : index
    %c0_3 = arith.constant 0 : index
    %c128 = arith.constant 128 : index
    %3 = vector.load %arg3[%c0_2, %c0_3, %c128] : memref<2x4x256xf32, #tpu.memory_space<vmem>>, vector<2x4x128xf32>
    %4 = math.absf %3 : vector<2x4x128xf32>
    %cst_4 = arith.constant dense<0.000000e+00> : vector<4x128xf32>
    %5 = vector.multi_reduction <add>, %4, %cst_4 [0] : vector<2x4x128xf32> to vector<4x128xf32>
    %6 = arith.addf %2, %5 : vector<4x128xf32>
    %c0_5 = arith.constant 0 : index
    %c0_6 = arith.constant 0 : index
    %c0_7 = arith.constant 0 : index
    %c0_8 = arith.constant 0 : index
    %7 = vector.load %arg4[%c0_5, %c0_6, %c0_7, %c0_8] : memref<1x1x4x128xf32, #tpu.memory_space<vmem>>, vector<1x1x4x128xf32>
    %8 = vector.shape_cast %7 : vector<1x1x4x128xf32> to vector<4x128xf32>
    %9 = vector.shape_cast %6 : vector<4x128xf32> to vector<1x1x4x128xf32>
    tpu.vector_store %arg4[%c0_5, %c0_6, %c0_7, %c0_8], %9 {strides = array<i32>} : memref<1x1x4x128xf32, #tpu.memory_space<vmem>>, vector<1x1x4x128xf32>,
    return
  }
  func.func @transform_0(%arg0: i32, %arg1: i32, %arg2: i32) -> (i32, i32, i32) {
    %c0_i32 = arith.constant 0 : i32
    return %arg0, %arg1, %arg2 : i32, i32, i32
  }
  func.func @transform_1(%arg0: i32, %arg1: i32, %arg2: i32) -> (i32, i32, i32, i32) {
    %c0_i32 = arith.constant 0 : i32
    %c0_i32_0 = arith.constant 0 : i32
    %c0_i32_1 = arith.constant 0 : i32
    return %arg0, %arg1, %c0_i32, %c0_i32_0 : i32, i32, i32, i32
  }
}

</mosaic_0001>

<bundles_post_ra>
// kernel: tpu_custom_call.1
= control target key start
LH: loop header
LB: loop body
LE: loop exit
PB: predicated region body
PF: predicated region fallthrough
CT: control target
= control target key end

     0   :  { %6 = vsyncpa [#allocation3], 0  ;;  %s145_s0 = inlined_call_operand.hbm [shape: f32[2,4,256], index: 0, kind: input, shape index: {}]   ;;  %s146_s1 = inlined_call_operand.hbm [shape: f32[1,1,4,128], index: 1, kind: output, shape index: {}]  }
   0x1   :  { %7 = vsyncpa [#allocation4], 0  ;;  %s107_s6 = smov [#allocation2]   ;;  %s59_s10 = scalar_lea.hbm %s145_s0, 256 }
   0x2   :  { %s13_s7 = sshll.u32 %s107_s6, 4  ;;  %p60_p0 = scmp.ne.s32.totalorder %s145_s0, %s59_s10  ;;  %s14_s7 = int_to_ptr.vmem [resolvable:$true] %s13_s7 }
   0x3   :  { %p63_p1 = scmp.lt.u32.totalorder %s59_s10, %s145_s0 }
   0x5   :  { %p65_p2 = pnand %p63_p1, %p60_p0 }
   0x7   :  { %68 = shalt.err (!%p65_p2)
}
   0x8   :  { %s69_s15 = scalar_lea.vmem %s14_s7, 256  ;;  %p74_p4 = scmp.lt.s32.totalorder %s14_s7, %s14_s7 }
   0x9   :  { %p70_p3 = scmp.ne.s32.totalorder %s14_s7, %s69_s15  ;;  %p75_p5 = scmp.lt.s32.totalorder %s69_s15, %s69_s15 }
   0xb   :  { %p76_p6 = por %p75_p5, %p74_p4 }
   0xd   :  { %p77_p7 = pnand %p76_p6, %p70_p3 }
   0xf   :  { %80 = shalt.err (!%p77_p7)
}
  0x10   :  { %s108_s16 = smov 128   ;;  %s109_s17 = smov 8  }
  0x11   :  { %19 = dma.hbm_to_vmem [thread:$0]  %s145_s0, 256, %s14_s7, [#allocation3], %s108_s16, %s108_s16, %s109_s17  }
  0x12   :  { %103 = dma.done.wait [#allocation3], 256  }
  0x13   :  { %104 = vsyncadd [#allocation3], 4294967040  ;;  %vm27_vm0 = vcmask 1043456   ;;  %v23_v0 = vld [vmem:[#allocation2] sm:$0xf]  ;;  %s110_s20 = smov [#allocation5]  }
  0x14   :  { %v24_v1 = vld [vmem:[#allocation2 + $0x8] sm:$0xf]  ;;  %v31_v2 = vld [vmem:[#allocation2 + $0x4] sm:$0xf]  ;;  %v25_v3 = vand.u32 2147483647, %v23_v0 }
  0x15   :  { %v26_v4 = vand.u32 2147483647, %v24_v1  ;;  %v32_v5 = vld [vmem:[#allocation2 + $0xc] sm:$0xf]  ;;  %v33_v6 = vand.u32 2147483647, %v31_v2 }
  0x16   :  { %v34_v7 = vand.u32 2147483647, %v32_v5  ;;  %v28_v8 = vsel %vm27_vm0, %v25_v3, 0.0  ;;  %s46_s21 = sshll.u32 %s110_s20, 4  ;;  %s47_s21 = int_to_ptr.vmem [resolvable:$true] %s46_s21 }
  0x17   :  { %v29_v9 = vsel %vm27_vm0, %v26_v4, 0.0  ;;  %v35_v11 = vsel %vm27_vm0, %v33_v6, 0.0  ;;  %s81_s0 = scalar_lea.vmem %s47_s21, 64  ;;  %p86_p9 = scmp.lt.s32.totalorder %s47_s21, %s47_s21 }
  0x18   :  { %v30_v10 = vadd.f32 %v29_v9, %v28_v8  ;;  %v36_v12 = vsel %vm27_vm0, %v34_v7, 0.0  ;;  %p82_p8 = scmp.ne.s32.totalorder %s47_s21, %s81_s0  ;;  %p87_p10 = scmp.lt.s32.totalorder %s81_s0, %s81_s0 }
  0x19   :  { %v37_v13 = vadd.f32 %v36_v12, %v35_v11 }
  0x1a   :  { %p88_p11 = por %p87_p10, %p86_p9 }
  0x1b   :  { %v38_v14 = vadd.f32 %v37_v13, %v30_v10 }
  0x1c   :  { %p89_p12 = pnand %p88_p11, %p82_p8 }
  0x1d   :  { %39 = vst [vmem:[#allocation5] sm:$0xf] %v38_v14 }
  0x1e   :  { %92 = shalt.err (!%p89_p12)
}
  0x1f   :  { %s93_s24 = scalar_lea.hbm %s146_s1, 64 }
  0x20   :  { %p94_p13 = scmp.ne.s32.totalorder %s146_s1, %s93_s24  ;;  %p97_p0 = scmp.lt.u32.totalorder %s93_s24, %s146_s1 }
  0x22   :  { %p99_p1 = pnand %p97_p0, %p94_p13 }
  0x24   :  { %102 = shalt.err (!%p99_p1)
}
  0x25   :  { %49 = dma.vmem_to_hbm [thread:$0]  %s47_s21, 64, %s146_s1, [#allocation4]  }
  0x26   :  { %105 = dma.done.wait [#allocation4], 64  }
  0x27   :  { %106 = vsyncadd [#allocation4], 4294967232 }
  0x28   :  { %53 = vsyncpa [#allocation3], 1 }
  0x29   :  { %54 = vsyncpa [#allocation4], 1 }

</bundles_post_ra>
